<compile_context>
chip_gen: v7x
topology: tpu7x:2x2x1
jax: 0.10.0
libtpu: 0.0.40
codegen_flags: <defaults>
</compile_context>

<pallas_src>
import functools

import jax
import jax.numpy as jnp
from jax.experimental import pallas as pl
from jax.experimental.pallas import tpu as pltpu

_LANE = 128
_SUBLANE = 8


def _round_up(n, m):
    return ((n + m - 1) // m) * m


def _pad_feature(d):
    """Pad an output-feature dim: 128 lanes, 256 when the layer is already wide
    (fills the 2x256x256 MXU on v6e/v7x; 128 is native on v5e)."""
    return _round_up(d, 256) if d >= 256 else _round_up(d, _LANE)


def _pick_batch_tile(B):
    """MXU-shaped M tile with bounded padding waste and >=2 grid steps when
    the batch allows it (v7x megacore)."""
    b_aligned = _round_up(B, _SUBLANE)
    if b_aligned <= 128:
        return b_aligned          # single tile == full array; MXU can't be fuller
    if b_aligned <= 256:
        return 128                # two tiles -> both v7x TensorCores busy
    return 256                    # big batch: 256-row MXU tile, cdiv grid


# ----------------------------- fused kernel ---------------------------------


def _encoder_kernel(x_ref, *refs, num_layers, slope):
    """Fused MLP: (Linear -> LeakyReLU) x (num_layers-1) -> Linear.

    BatchNorm (eval) is pre-folded into weights/bias at prepare time and
    dropout=0 is the identity, so the body is MXU dot + bias + max().
    All layer parameters are VMEM-resident; intermediates never leave VMEM.
    """
    o_ref = refs[-1]
    params = refs[:-1]  # interleaved (w0, b0, w1, b1, ..., w_out, b_out)

    h = x_ref[...]  # (TB, in_dim) bf16
    for i in range(num_layers):
        w = params[2 * i][...]        # (K_i, N_i) bf16
        b = params[2 * i + 1][...]    # (1, N_i) f32
        acc = jnp.dot(h, w, preferred_element_type=jnp.float32) + b
        if i < num_layers - 1:
            # LeakyReLU, slope in [0, 1]: max(h, slope*h) == where(h>=0, h, slope*h)
            acc = jnp.maximum(acc, slope * acc)
            h = acc.astype(jnp.bfloat16)   # bf16 inter-layer activations
        else:
            h = acc
    o_ref[...] = h.astype(o_ref.dtype)


# ----------------------- one-time parameter preparation ----------------------


def prepare_encoder_params(params, *, eps=1e-5):
    """Fold eval-mode BatchNorm into the Linears, zero-pad feature dims, cast
    weights to bf16.  Call ONCE at model-load time; the result is what
    encoder_forward consumes (no per-call weight traffic)."""
    folded = []
    for (w, b, gamma, beta, rmean, rvar) in params["hidden"]:
        scale = gamma * jax.lax.rsqrt(rvar + eps)        # (1, out)
        folded.append((w * scale, (b - rmean) * scale + beta))
    folded.append(params["out"])                         # output layer: no BN / act

    in_dim = folded[0][0].shape[0]
    latent_dim = folded[-1][0].shape[1]

    layers = []
    k_prev = in_dim  # first-layer K kept at its true size (x is not K-padded)
    for (w_f, b_f) in folded:
        fi, fo = w_f.shape
        fo_p = _pad_feature(fo)
        # Exact zero-padding: padded activation lanes are always 0 (zero weight
        # cols + zero bias, LeakyReLU(0)=0), and the extra zero weight rows only
        # ever multiply those zero lanes.
        w_p = jnp.zeros((k_prev, fo_p), jnp.float32).at[:fi, :fo].set(w_f)
        b_p = jnp.zeros((1, fo_p), jnp.float32).at[:, :fo].set(b_f)
        layers.append((w_p.astype(jnp.bfloat16), b_p))
        k_prev = fo_p

    return {
        "layers": layers,          # [(bf16 (K,N_pad), f32 (1,N_pad)), ...]
        "in_dim": in_dim,
        "latent_dim": latent_dim,
        "out_pad": layers[-1][0].shape[1],
    }


def _vmem_budget_bytes(layers, batch_tile, in_dim, out_pad):
    w_bytes = sum(w.size * 2 + b.size * 4 for w, b in layers)
    x_bytes = batch_tile * in_dim * 2                       # bf16 x tile
    o_bytes = batch_tile * out_pad * 4                      # f32 out tile
    max_w = max(w.shape[1] for w, _ in layers)
    act_bytes = batch_tile * max_w * (4 + 2)                # f32 acc + bf16 copy
    # Every BlockSpec operand is double-buffered by the pipeline.
    needed = 2 * (w_bytes + x_bytes + o_bytes) + 2 * act_bytes
    # Generous headroom, clamped to v7x's 64 MiB physical VMEM per TC.
    return int(min(max(2 * needed, 32 << 20), 64 << 20))


# ----------------------------- forward wrapper --------------------------------


def encoder_forward(prepared, x, *, leaky_slope=0.2, batch_tile=None):
    """Encoder.forward (eval mode) as a single fused Pallas kernel.

    `prepared` must come from prepare_encoder_params (weights already folded,
    padded, bf16)."""
    assert 0.0 <= leaky_slope <= 1.0, "max(h, slope*h) requires slope in [0, 1]"

    layers = prepared["layers"]
    in_dim = prepared["in_dim"]
    latent_dim = prepared["latent_dim"]
    out_pad = prepared["out_pad"]
    num_layers = len(layers)

    B, x_in = x.shape
    assert x_in == in_dim

    # ---- Batch tiling (grid via cdiv; padding waste bounded to one tile).
    if batch_tile is None:
        batch_tile = _pick_batch_tile(B)
    grid_b = pl.cdiv(B, batch_tile)
    B_pad = grid_b * batch_tile

    # ---- bf16 input, K dim kept at its true width (full-array block).
    x_bf = x.astype(jnp.bfloat16)
    if B_pad != B:
        x_bf = jnp.zeros((B_pad, in_dim), jnp.bfloat16).at[:B].set(x_bf)

    in_specs = [pl.BlockSpec((batch_tile, in_dim), lambda i: (i, 0))]
    args = [x_bf]
    for (w_p, b_p) in layers:
        # Weights/bias pinned across batch tiles (block index always (0, 0)).
        in_specs.append(pl.BlockSpec(w_p.shape, lambda i: (0, 0)))
        in_specs.append(pl.BlockSpec(b_p.shape, lambda i: (0, 0)))
        args += [w_p, b_p]
    out_specs = pl.BlockSpec((batch_tile, out_pad), lambda i: (i, 0))

    flops = 2 * B_pad * sum(w.shape[0] * w.shape[1] for w, _ in layers)
    bytes_accessed = (x_bf.size * 2
                      + sum(w.size * 2 + b.size * 4 for w, b in layers)
                      + B_pad * out_pad * 4)

    kern = functools.partial(_encoder_kernel,
                             num_layers=num_layers, slope=float(leaky_slope))
    out_p = pl.pallas_call(
        kern,
        out_shape=jax.ShapeDtypeStruct((B_pad, out_pad), jnp.float32),
        grid=(grid_b,),
        in_specs=in_specs,
        out_specs=out_specs,
        compiler_params=pltpu.CompilerParams(
            dimension_semantics=("parallel",),
            vmem_limit_bytes=_vmem_budget_bytes(layers, batch_tile,
                                                in_dim, out_pad)),
        cost_estimate=pl.CostEstimate(flops=flops,
                                      transcendentals=0,
                                      bytes_accessed=bytes_accessed),
    )(*args)

    return out_p[:B, :latent_dim]


# ----------------------------- reference & init -------------------------------


def encoder_reference(params, x, *, leaky_slope=0.2, eps=1e-5):
    """Pure-JAX f32 reference of the eval-mode PyTorch forward."""
    h = x
    for (w, b, gamma, beta, rmean, rvar) in params["hidden"]:
        h = h @ w + b
        h = (h - rmean) * (gamma * jax.lax.rsqrt(rvar + eps)) + beta
        h = jnp.where(h >= 0, h, leaky_slope * h)
    w_out, b_out = params["out"]
    return h @ w_out + b_out


def init_encoder_params(key, input_dim, hidden_dim, latent_dim):
    """Deterministic synthetic parameters mirroring the PyTorch module shapes.

    Linear weights stored as (in_features, out_features) so y = x @ W + b."""
    dims = [input_dim] + list(hidden_dim)
    params = {"hidden": [], "out": None}
    for i in range(len(hidden_dim)):
        key, kw, kb, kg, kbe, km, kv = jax.random.split(key, 7)
        fan_in, fan_out = dims[i], dims[i + 1]
        w = jax.random.normal(kw, (fan_in, fan_out), jnp.float32) * 0.1
        b = jax.random.normal(kb, (1, fan_out), jnp.float32) * 0.01
        gamma = 1.0 + 0.1 * jax.random.normal(kg, (1, fan_out), jnp.float32)
        beta = 0.01 * jax.random.normal(kbe, (1, fan_out), jnp.float32)
        rmean = 0.01 * jax.random.normal(km, (1, fan_out), jnp.float32)
        rvar = 1.0 + 0.1 * jax.random.uniform(kv, (1, fan_out), jnp.float32)
        params["hidden"].append((w, b, gamma, beta, rmean, rvar))
    key, kw, kb = jax.random.split(key, 3)
    w_out = jax.random.normal(kw, (hidden_dim[-1], latent_dim), jnp.float32) * 0.1
    b_out = jax.random.normal(kb, (1, latent_dim), jnp.float32) * 0.01
    params["out"] = (w_out, b_out)
    return params


# ----------------------------- main ------------------------------------------

if __name__ == "__main__":
    key = jax.random.PRNGKey(0)
    k_params, k_x = jax.random.split(key)

    # Small, module-consistent shapes.
    batch = 8
    input_dim = 32
    hidden_dim = [64, 32]
    latent_dim = 16

    params = init_encoder_params(k_params, input_dim, hidden_dim, latent_dim)
    x = jax.random.normal(k_x, (batch, input_dim), jnp.float32)

    # One-time weight preparation (BN fold + pad + bf16) -- hoisted out of forward.
    prepared = jax.tree_util.tree_map(jax.block_until_ready,
                                      prepare_encoder_params(params))

    out = encoder_forward(prepared, x, leaky_slope=0.2)
    out = jax.block_until_ready(out)

    assert out.shape == (batch, latent_dim), out.shape
    assert out.dtype == jnp.float32
    assert bool(jnp.all(jnp.isfinite(out)))

    # Loose-tolerance check vs f32 reference (weights/activations are bf16 on MXU).
    ref = encoder_reference(params, x, leaky_slope=0.2)
    assert bool(jnp.allclose(out, ref, rtol=5e-2, atol=5e-2)), \
        float(jnp.max(jnp.abs(out - ref)))

    print("KERNEL_OK")
</pallas_src>

<mosaic_0001>
module attributes {stable_mosaic.version = 11 : i64} {
  func.func @_encoder_kernel(%arg0: i32, %arg1: memref<8x32xbf16, #tpu.memory_space<vmem>>, %arg2: memref<32x128xbf16, #tpu.memory_space<vmem>>, %arg3: memref<1x128xf32, #tpu.memory_space<vmem>>, %arg4: memref<128x128xbf16, #tpu.memory_space<vmem>>, %arg5: memref<1x128xf32, #tpu.memory_space<vmem>>, %arg6: memref<128x128xbf16, #tpu.memory_space<vmem>>, %arg7: memref<1x128xf32, #tpu.memory_space<vmem>>, %arg8: memref<8x128xf32, #tpu.memory_space<vmem>>) attributes {dimension_semantics = [#tpu.dimension_semantics<parallel>], iteration_bounds = array<i64: 1>, scalar_prefetch = 0 : i64, scratch_operands = 0 : i64, tpu.core_type = #tpu.core_type<tc>, window_params = [{transform_indices = @transform_0, window_bounds = array<i64: 8, 32>}, {pipeline_mode = #tpu.pipeline_mode<synchronous>, transform_indices = @transform_1, window_bounds = array<i64: 32, 128>}, {pipeline_mode = #tpu.pipeline_mode<synchronous>, transform_indices = @transform_2, window_bounds = array<i64: 1, 128>}, {pipeline_mode = #tpu.pipeline_mode<synchronous>, transform_indices = @transform_3, window_bounds = array<i64: 128, 128>}, {pipeline_mode = #tpu.pipeline_mode<synchronous>, transform_indices = @transform_4, window_bounds = array<i64: 1, 128>}, {pipeline_mode = #tpu.pipeline_mode<synchronous>, transform_indices = @transform_5, window_bounds = array<i64: 128, 128>}, {pipeline_mode = #tpu.pipeline_mode<synchronous>, transform_indices = @transform_6, window_bounds = array<i64: 1, 128>}, {transform_indices = @transform_7, window_bounds = array<i64: 8, 128>}]} {
    %c0 = arith.constant 0 : index
    %c0_0 = arith.constant 0 : index
    %0 = vector.load %arg1[%c0, %c0_0] : memref<8x32xbf16, #tpu.memory_space<vmem>>, vector<8x32xbf16>
    %c0_1 = arith.constant 0 : index
    %c0_2 = arith.constant 0 : index
    %1 = vector.load %arg2[%c0_1, %c0_2] : memref<32x128xbf16, #tpu.memory_space<vmem>>, vector<32x128xbf16>
    %c0_3 = arith.constant 0 : index
    %c0_4 = arith.constant 0 : index
    %2 = vector.load %arg3[%c0_3, %c0_4] : memref<1x128xf32, #tpu.memory_space<vmem>>, vector<1x128xf32>
    %cst = arith.constant dense<0.000000e+00> : vector<8x128xf32>
    %3 = tpu.matmul %0, %1, %cst {dimension_numbers = #tpu.dot_dimension_numbers<[1], [0], [0], [1], [0, 0, 1, 1], [], []>} : vector<8x32xbf16>, vector<32x128xbf16>, vector<8x128xf32> -> vector<8x128xf32>
    %4 = vector.broadcast %2 : vector<1x128xf32> to vector<8x128xf32>
    %5 = arith.addf %3, %4 : vector<8x128xf32>
    %cst_5 = arith.constant 2.000000e-01 : f32
    %6 = vector.broadcast %cst_5 : f32 to vector<8x128xf32>
    %7 = arith.mulf %6, %5 : vector<8x128xf32>
    %8 = arith.maximumf %5, %7 : vector<8x128xf32>
    %9 = arith.truncf %8 : vector<8x128xf32> to vector<8x128xbf16>
    %c0_6 = arith.constant 0 : index
    %c0_7 = arith.constant 0 : index
    %10 = vector.load %arg4[%c0_6, %c0_7] : memref<128x128xbf16, #tpu.memory_space<vmem>>, vector<128x128xbf16>
    %c0_8 = arith.constant 0 : index
    %c0_9 = arith.constant 0 : index
    %11 = vector.load %arg5[%c0_8, %c0_9] : memref<1x128xf32, #tpu.memory_space<vmem>>, vector<1x128xf32>
    %cst_10 = arith.constant dense<0.000000e+00> : vector<8x128xf32>
    %12 = tpu.matmul %9, %10, %cst_10 {dimension_numbers = #tpu.dot_dimension_numbers<[1], [0], [0], [1], [0, 0, 1, 1], [], []>} : vector<8x128xbf16>, vector<128x128xbf16>, vector<8x128xf32> -> vector<8x128xf32>
    %13 = vector.broadcast %11 : vector<1x128xf32> to vector<8x128xf32>
    %14 = arith.addf %12, %13 : vector<8x128xf32>
    %cst_11 = arith.constant 2.000000e-01 : f32
    %15 = vector.broadcast %cst_11 : f32 to vector<8x128xf32>
    %16 = arith.mulf %15, %14 : vector<8x128xf32>
    %17 = arith.maximumf %14, %16 : vector<8x128xf32>
    %18 = arith.truncf %17 : vector<8x128xf32> to vector<8x128xbf16>
    %c0_12 = arith.constant 0 : index
    %c0_13 = arith.constant 0 : index
    %19 = vector.load %arg6[%c0_12, %c0_13] : memref<128x128xbf16, #tpu.memory_space<vmem>>, vector<128x128xbf16>
    %c0_14 = arith.constant 0 : index
    %c0_15 = arith.constant 0 : index
    %20 = vector.load %arg7[%c0_14, %c0_15] : memref<1x128xf32, #tpu.memory_space<vmem>>, vector<1x128xf32>
    %cst_16 = arith.constant dense<0.000000e+00> : vector<8x128xf32>
    %21 = tpu.matmul %18, %19, %cst_16 {dimension_numbers = #tpu.dot_dimension_numbers<[1], [0], [0], [1], [0, 0, 1, 1], [], []>} : vector<8x128xbf16>, vector<128x128xbf16>, vector<8x128xf32> -> vector<8x128xf32>
    %22 = vector.broadcast %20 : vector<1x128xf32> to vector<8x128xf32>
    %23 = arith.addf %21, %22 : vector<8x128xf32>
    %c0_17 = arith.constant 0 : index
    %c0_18 = arith.constant 0 : index
    %24 = vector.load %arg8[%c0_17, %c0_18] : memref<8x128xf32, #tpu.memory_space<vmem>>, vector<8x128xf32>
    tpu.vector_store %arg8[%c0_17, %c0_18], %23 {strides = array<i32>} : memref<8x128xf32, #tpu.memory_space<vmem>>, vector<8x128xf32>,
    return
  }
  func.func @transform_0(%arg0: i32) -> (i32, i32) {
    %c0_i32 = arith.constant 0 : i32
    %c0_i32_0 = arith.constant 0 : i32
    return %arg0, %c0_i32 : i32, i32
  }
  func.func @transform_1(%arg0: i32) -> (i32, i32) {
    %c0_i32 = arith.constant 0 : i32
    %c0_i32_0 = arith.constant 0 : i32
    %c0_i32_1 = arith.constant 0 : i32
    return %c0_i32, %c0_i32_0 : i32, i32
  }
  func.func @transform_2(%arg0: i32) -> (i32, i32) {
    %c0_i32 = arith.constant 0 : i32
    %c0_i32_0 = arith.constant 0 : i32
    %c0_i32_1 = arith.constant 0 : i32
    return %c0_i32, %c0_i32_0 : i32, i32
  }
  func.func @transform_3(%arg0: i32) -> (i32, i32) {
    %c0_i32 = arith.constant 0 : i32
    %c0_i32_0 = arith.constant 0 : i32
    %c0_i32_1 = arith.constant 0 : i32
    return %c0_i32, %c0_i32_0 : i32, i32
  }
  func.func @transform_4(%arg0: i32) -> (i32, i32) {
    %c0_i32 = arith.constant 0 : i32
    %c0_i32_0 = arith.constant 0 : i32
    %c0_i32_1 = arith.constant 0 : i32
    return %c0_i32, %c0_i32_0 : i32, i32
  }
  func.func @transform_5(%arg0: i32) -> (i32, i32) {
    %c0_i32 = arith.constant 0 : i32
    %c0_i32_0 = arith.constant 0 : i32
    %c0_i32_1 = arith.constant 0 : i32
    return %c0_i32, %c0_i32_0 : i32, i32
  }
  func.func @transform_6(%arg0: i32) -> (i32, i32) {
    %c0_i32 = arith.constant 0 : i32
    %c0_i32_0 = arith.constant 0 : i32
    %c0_i32_1 = arith.constant 0 : i32
    return %c0_i32, %c0_i32_0 : i32, i32
  }
  func.func @transform_7(%arg0: i32) -> (i32, i32) {
    %c0_i32 = arith.constant 0 : i32
    %c0_i32_0 = arith.constant 0 : i32
    return %arg0, %c0_i32 : i32, i32
  }
}

</mosaic_0001>

<bundles_post_ra>
// kernel: tpu_custom_call.1
= control target key start
LH: loop header
LB: loop body
LE: loop exit
PB: predicated region body
PF: predicated region fallthrough
CT: control target
= control target key end

     0   :  { %12 = vsyncpa [#allocation3], 0  ;;  %s782_s0 = inlined_call_operand.hbm [shape: bf16[8,32], index: 0, kind: input, shape index: {}]   ;;  %s783_s1 = inlined_call_operand.hbm [shape: bf16[32,128], index: 1, kind: input, shape index: {}]   ;;  %s784_s2 = inlined_call_operand.vmem [shape: f32[1,128], index: 2, kind: input, shape index: {}]   ;;  %s785_s3 = inlined_call_operand.hbm [shape: bf16[128,128], index: 3, kind: input, shape index: {}]   ;;  %s786_s4 = inlined_call_operand.vmem [shape: f32[1,128], index: 4, kind: input, shape index: {}]   ;;  %s787_s5 = inlined_call_operand.hbm [shape: bf16[128,128], index: 5, kind: input, shape index: {}]   ;;  %s788_s6 = inlined_call_operand.vmem [shape: f32[1,128], index: 6, kind: input, shape index: {}]   ;;  %s789_s7 = inlined_call_operand.hbm [shape: f32[8,128], index: 7, kind: output, shape index: {}]  }
   0x1   :  { %13 = vsyncpa [#allocation6], 0 }
   0x2   :  { %14 = vsyncpa [#allocation9], 0 }
   0x3   :  { %15 = vsyncpa [#allocation4], 0  ;;  %s631_s24 = smov [#allocation5]   ;;  %s513_s28 = scalar_lea.hbm %s783_s1, 256 }
   0x4   :  { %s31_s25 = sshll.u32 %s631_s24, 4  ;;  %p514_p0 = scmp.ne.s32.totalorder %s783_s1, %s513_s28  ;;  %s32_s25 = int_to_ptr.vmem [resolvable:$true] %s31_s25 }
   0x5   :  { %p517_p1 = scmp.lt.u32.totalorder %s513_s28, %s783_s1 }
   0x7   :  { %p519_p2 = pnand %p517_p1, %p514_p0 }
   0x9   :  { %522 = shalt.err (!%p519_p2)
}
   0xa   :  { %s523_s10 = scalar_lea.vmem %s32_s25, 256  ;;  %p528_p4 = scmp.lt.s32.totalorder %s32_s25, %s32_s25 }
   0xb   :  { %p524_p3 = scmp.ne.s32.totalorder %s32_s25, %s523_s10  ;;  %p529_p5 = scmp.lt.s32.totalorder %s523_s10, %s523_s10 }
   0xd   :  { %p530_p6 = por %p529_p5, %p528_p4 }
   0xf   :  { %p531_p7 = pnand %p530_p6, %p524_p3 }
  0x11   :  { %534 = shalt.err (!%p531_p7)
}
  0x12   :  { %s632_s11 = smov 64   ;;  %s633_s12 = smov 4  }
  0x13   :  { %37 = dma.hbm_to_vmem [thread:$0]  %s783_s1, 256, %s32_s25, [#allocation6], %s632_s11, %s632_s11, %s633_s12  }
  0x14   :  { %s634_s15 = smov [#allocation2]   ;;  %s635_s17 = smov [#allocation7]  }
  0x15   :  { %s22_s16 = sshll.u32 %s634_s15, 4  ;;  %s45_s18 = sshll.u32 %s635_s17, 4  ;;  %s23_s16 = int_to_ptr.vmem [resolvable:$true] %s22_s16  ;;  %s46_s18 = int_to_ptr.vmem [resolvable:$true] %s45_s18 }
  0x16   :  { %s535_s21 = scalar_lea.hbm %s782_s0, 64 }
  0x17   :  { %p536_p8 = scmp.ne.s32.totalorder %s782_s0, %s535_s21  ;;  %p539_p9 = scmp.lt.u32.totalorder %s535_s21, %s782_s0 }
  0x19   :  { %p541_p10 = pnand %p539_p9, %p536_p8 }
  0x1b   :  { %544 = shalt.err (!%p541_p10)
}
  0x1c   :  { %s545_s1 = scalar_lea.vmem %s23_s16, 64  ;;  %p550_p12 = scmp.lt.s32.totalorder %s23_s16, %s23_s16 }
  0x1d   :  { %p546_p11 = scmp.ne.s32.totalorder %s23_s16, %s545_s1  ;;  %p551_p13 = scmp.lt.s32.totalorder %s545_s1, %s545_s1 }
  0x1f   :  { %p552_p0 = por %p551_p13, %p550_p12 }
  0x21   :  { %p553_p1 = pnand %p552_p0, %p546_p11 }
  0x23   :  { %556 = shalt.err (!%p553_p1)
}
  0x24   :  { %25 = dma.hbm_to_vmem [thread:$0]  %s782_s0, 64, %s23_s16, [#allocation3]  }
  0x25   :  { %s557_s30 = scalar_lea.hbm %s785_s3, 1024 }
  0x26   :  { %p558_p2 = scmp.ne.s32.totalorder %s785_s3, %s557_s30  ;;  %p561_p3 = scmp.lt.u32.totalorder %s557_s30, %s785_s3 }
  0x28   :  { %p563_p4 = pnand %p561_p3, %p558_p2 }
  0x2a   :  { %566 = shalt.err (!%p563_p4)
}
  0x2b   :  { %s567_s14 = scalar_lea.vmem %s46_s18, 1024  ;;  %p572_p6 = scmp.lt.s32.totalorder %s46_s18, %s46_s18 }
  0x2c   :  { %p568_p5 = scmp.ne.s32.totalorder %s46_s18, %s567_s14  ;;  %p573_p7 = scmp.lt.s32.totalorder %s567_s14, %s567_s14 }
  0x2e   :  { %p574_p8 = por %p573_p7, %p572_p6 }
  0x30   :  { %p575_p9 = pnand %p574_p8, %p568_p5 }
  0x32   :  { %578 = shalt.err (!%p575_p9)
}
  0x33   :  { %51 = dma.hbm_to_vmem [thread:$0]  %s785_s3, 1024, %s46_s18, [#allocation6], %s632_s11, %s632_s11, %s633_s12  }
  0x34   :  { %s636_s16 = smov [#allocation8]   ;;  %s579_s21 = scalar_lea.hbm %s787_s5, 1024 }
  0x35   :  { %s59_s17 = sshll.u32 %s636_s16, 4  ;;  %p580_p10 = scmp.ne.s32.totalorder %s787_s5, %s579_s21  ;;  %s60_s17 = int_to_ptr.vmem [resolvable:$true] %s59_s17 }
  0x36   :  { %p583_p11 = scmp.lt.u32.totalorder %s579_s21, %s787_s5 }
  0x38   :  { %p585_p12 = pnand %p583_p11, %p580_p10 }
  0x3a   :  { %588 = shalt.err (!%p585_p12)
}
  0x3b   :  { %s589_s1 = scalar_lea.vmem %s60_s17, 1024  ;;  %p594_p0 = scmp.lt.s32.totalorder %s60_s17, %s60_s17 }
  0x3c   :  { %p590_p13 = scmp.ne.s32.totalorder %s60_s17, %s589_s1  ;;  %p595_p1 = scmp.lt.s32.totalorder %s589_s1, %s589_s1 }
  0x3e   :  { %p596_p2 = por %p595_p1, %p594_p0 }
  0x40   :  { %p597_p3 = pnand %p596_p2, %p590_p13 }
  0x42   :  { %600 = shalt.err (!%p597_p3)
}
  0x43   :  { %65 = dma.hbm_to_vmem [thread:$0]  %s787_s5, 1024, %s60_s17, [#allocation9], %s632_s11, %s632_s11, %s633_s12  }
  0x44   :  { %623 = dma.done.wait [#allocation3], 64  }
  0x45   :  { %624 = vsyncadd [#allocation3], 4294967232 }
  0x46   :  { %625 = dma.done.wait [#allocation6], 1280  }
  0x47   :  { %626 = vsyncadd [#allocation6], 4294966016 }
  0x48   :  { %627 = dma.done.wait [#allocation9], 1024  }
  0x49   :  { %628 = vsyncadd [#allocation9], 4294966272  ;;  %v637_v0 = vmov 0.0   ;;  %vm638_vm0 = vmmov 0   ;;  %v495_v1 = vld [vmem:[#allocation5] sm:$0xff]   ;;  %v496_v2 = vld [vmem:[#allocation5 + $0x8] sm:$0xff]  }
  0x4a   :  { %438 = vmatprep.subr.bf16.mxu0 %v637_v0  ;;  %442 = vmatprep.mubr.msk.bf16.mxu0 %vm638_vm0, %v637_v0  ;;  %v497_v3 = vld [vmem:[#allocation7] sm:$0xff]   ;;  %vm105_vm1 = vcmask 261120   ;;  %v498_v4 = vld [vmem:[#allocation7 + $0x8] sm:$0xff]   ;;  %v499_v6 = vld [vmem:[#allocation7 + $0x10] sm:$0xff]   ;;  %s639_s28 = smov [#allocation10]  }
  0x4b   :  { %446 = vmatprep.subr.bf16.mxu1 %v637_v0  ;;  %462 = vmatprep.mubr.msk.bf16.mxu1 %vm638_vm0, %v637_v0  ;;  %v81_v5 = vld [vmem:[#allocation2] sm:$0xf]  ;;  %v500_v7 = vld [vmem:[#allocation7 + $0x18] sm:$0xff]   ;;  %v501_v8 = vld [vmem:[#allocation7 + $0x20] sm:$0xff]   ;;  %s384_s29 = sshll.u32 %s639_s28, 4  ;;  %s385_s29 = int_to_ptr.vmem [resolvable:$true] %s384_s29 }
  0x4c   :  { %439 = vmatpush3.bf16.msra.mxu0 %v495_v1  ;;  %447 = vmatpush3.bf16.msra.mxu1 %v497_v3  ;;  %v502_v9 = vld [vmem:[#allocation7 + $0x28] sm:$0xff]   ;;  %v503_v10 = vld [vmem:[#allocation7 + $0x30] sm:$0xff]   ;;  %v504_v11 = vld [vmem:[#allocation7 + $0x38] sm:$0xff]   ;;  %p606_p5 = scmp.lt.s32.totalorder %s385_s29, %s385_s29 }
  0x4d   :  { %440 = vmatprep.subr.bf16.mxu0 %v637_v0  ;;  %448 = vmatprep.subr.bf16.mxu1 %v637_v0  ;;  %v505_v12 = vld [vmem:[#allocation8] sm:$0xff]   ;;  %v506_v13 = vld [vmem:[#allocation8 + $0x8] sm:$0xff]   ;;  %v507_v14 = vld [vmem:[#allocation8 + $0x10] sm:$0xff]  }
  0x4e   :  { %v508_v15 = vld [vmem:[#allocation8 + $0x18] sm:$0xff]   ;;  %v509_v16 = vld [vmem:[#allocation8 + $0x20] sm:$0xff]   ;;  %v510_v17 = vld [vmem:[#allocation8 + $0x28] sm:$0xff]  }
  0x4f   :  { %v395_v18 = vld [vmem:[%s784_s2] ss:$0 sm:$0xff]  ;;  %v511_v27 = vld [vmem:[#allocation8 + $0x30] sm:$0xff]   ;;  %v512_v28 = vld [vmem:[#allocation8 + $0x38] sm:$0xff]  }
  0x50   :  { %441 = vmatpush3.bf16.msra.mxu0 %v496_v2  ;;  %449 = vmatpush3.bf16.msra.mxu1 %v498_v4  ;;  %v399_v29 = vld [vmem:[%s786_s4] ss:$0 sm:$0xff]  ;;  %s601_s4 = scalar_lea.vmem %s385_s29, 128 }
  0x51   :  { %466 = vmatprep.subr.bf16.mxu0 %v637_v0  ;;  %450 = vmatprep.subr.bf16.mxu1 %v637_v0  ;;  %v408_v38 = vld [vmem:[%s788_s6] ss:$0 sm:$0xff]  ;;  %p602_p4 = scmp.ne.s32.totalorder %s385_s29, %s601_s4  ;;  %p607_p6 = scmp.lt.s32.totalorder %s601_s4, %s601_s4 }
  0x53   :  { %443 = vmatmul.mubr.msk.bf16.vlgmr.msra.gmra.mrb[0].mxu0 %vm105_vm1, %v81_v5  ;;  %p608_p7 = por %p607_p6, %p606_p5 }
  0x54   :  { %482 = vmatprep.mubr.msk.bf16.mxu0 %vm638_vm0, %v637_v0  ;;  %451 = vmatpush3.bf16.msra.mxu1 %v499_v6 }
  0x55   :  { %452 = vmatprep.subr.bf16.mxu1 %v637_v0  ;;  %467 = vmatpush3.bf16.msra.mxu0 %v505_v12  ;;  %p609_p8 = pnand %p608_p7, %p602_p4 }
  0x56   :  { %468 = vmatprep.subr.bf16.mxu0 %v637_v0 }
  0x58   :  { %453 = vmatpush3.bf16.msra.mxu1 %v500_v7 }
  0x59   :  { %454 = vmatprep.subr.bf16.mxu1 %v637_v0  ;;  %469 = vmatpush3.bf16.msra.mxu0 %v506_v13 }
  0x5a   :  { %470 = vmatprep.subr.bf16.mxu0 %v637_v0 }
  0x5c   :  { %455 = vmatpush3.bf16.msra.mxu1 %v501_v8 }
  0x5d   :  { %456 = vmatprep.subr.bf16.mxu1 %v637_v0  ;;  %471 = vmatpush3.bf16.msra.mxu0 %v507_v14 }
  0x5e   :  { %472 = vmatprep.subr.bf16.mxu0 %v637_v0 }
  0x60   :  { %457 = vmatpush3.bf16.msra.mxu1 %v502_v9 }
  0x61   :  { %458 = vmatprep.subr.bf16.mxu1 %v637_v0  ;;  %473 = vmatpush3.bf16.msra.mxu0 %v508_v15 }
  0x62   :  { %474 = vmatprep.subr.bf16.mxu0 %v637_v0 }
  0x64   :  { %459 = vmatpush3.bf16.msra.mxu1 %v503_v10 }
  0x65   :  { %460 = vmatprep.subr.bf16.mxu1 %v637_v0  ;;  %475 = vmatpush3.bf16.msra.mxu0 %v509_v16 }
  0x66   :  { %476 = vmatprep.subr.bf16.mxu0 %v637_v0 }
  0x68   :  { %461 = vmatpush3.bf16.msra.mxu1 %v504_v11 }
  0x69   :  { %477 = vmatpush3.bf16.msra.mxu0 %v510_v17 }
  0x6a   :  { %478 = vmatprep.subr.bf16.mxu0 %v637_v0 }
  0x6d   :  { %479 = vmatpush3.bf16.msra.mxu0 %v511_v27 }
  0x6e   :  { %480 = vmatprep.subr.bf16.mxu0 %v637_v0 }
  0x71   :  { %481 = vmatpush3.bf16.msra.mxu0 %v512_v28 }
 0x126   :  { %v143_v19 = vpop.f32.mrb[0].mxu0 }
 0x127   :  { %v144_v20 = vadd.f32 %v395_v18, %v143_v19  ;;  %v444_v21 = vpop.f32.mrb[1].mxu0 }
 0x128   :  { %v146_v22 = vpop.f32.mrb[2].mxu0 }
 0x129   :  { %v149_v23 = vmul.f32 0.2, %v144_v20  ;;  %v445_v24 = vpop.f32.mrb[3].mxu0 }
 0x12b   :  { %v150_v25 = vmax.f32 %v144_v20, %v149_v23 }
 0x12d   :  { %v151_v26 = vpack.c.bf16 %v150_v25, %v150_v25 }
 0x12f   :  { %463 = vmatmul.mubr.bf16.vlgmr.msra.gmra.mrb[0].mxu1 %v151_v26 }
 0x202   :  { %v257_v30 = vpop.f32.mrb[0].mxu1 }
 0x203   :  { %v258_v31 = vadd.f32 %v399_v29, %v257_v30  ;;  %v464_v32 = vpop.f32.mrb[1].mxu1 }
 0x204   :  { %v260_v33 = vpop.f32.mrb[2].mxu1 }
 0x205   :  { %v263_v34 = vmul.f32 0.2, %v258_v31  ;;  %v465_v35 = vpop.f32.mrb[3].mxu1 }
 0x207   :  { %v264_v36 = vmax.f32 %v258_v31, %v263_v34 }
 0x209   :  { %v265_v37 = vpack.c.bf16 %v264_v36, %v264_v36 }
 0x20b   :  { %483 = vmatmul.mubr.bf16.vlgmr.msra.gmra.mrb[4].mxu0 %v265_v37 }
 0x2de   :  { %v371_v39 = vpop.f32.mrb[4].mxu0 }
 0x2df   :  { %v372_v40 = vadd.f32 %v408_v38, %v371_v39  ;;  %v484_v41 = vpop.f32.mrb[5].mxu0 }
 0x2e0   :  { %v374_v42 = vpop.f32.mrb[6].mxu0 }
 0x2e1   :  { %377 = vst [vmem:[#allocation10] sm:$0xff] %v372_v40  ;;  %v485_v43 = vpop.f32.mrb[7].mxu0 }
 0x2e2   :  { %612 = shalt.err (!%p609_p8)
}
 0x2e3   :  { %s613_s6 = scalar_lea.hbm %s789_s7, 128 }
 0x2e4   :  { %p614_p9 = scmp.ne.s32.totalorder %s789_s7, %s613_s6  ;;  %p617_p10 = scmp.lt.u32.totalorder %s613_s6, %s789_s7 }
 0x2e6   :  { %p619_p11 = pnand %p617_p10, %p614_p9 }
 0x2e8   :  { %622 = shalt.err (!%p619_p11)
}
 0x2e9   :  { %387 = dma.vmem_to_hbm [thread:$0]  %s385_s29, 128, %s789_s7, [#allocation4]  }
 0x2ea   :  { %629 = dma.done.wait [#allocation4], 128  }
 0x2eb   :  { %630 = vsyncadd [#allocation4], 4294967168 }
 0x2ec   :  { %391 = vsyncpa [#allocation3], 1 }
 0x2ed   :  { %392 = vsyncpa [#allocation6], 1 }
 0x2ee   :  { %393 = vsyncpa [#allocation9], 1 }
 0x2ef   :  { %394 = vsyncpa [#allocation4], 1 }

</bundles_post_ra>
